<compile_context>
chip_gen: v5e
topology: v5e:2x2
jax: 0.10.0
libtpu: 0.0.40
codegen_flags: <defaults>
</compile_context>

<pallas_src>
import jax
import jax.numpy as jnp
from jax.experimental import pallas as pl
from jax.experimental.pallas import tpu as pltpu

# ---- small, TPU-friendly config ----
N_INSTANCES = 256      # instances (patches) in the bag
D_IN        = 256      # raw per-instance input dim fed to the feature extractor
FEAT_SIZE   = 128      # feature_size (output dim of feature_extractor)
NUM_CLS     = 2        # output_class
LANE_PAD    = 128      # fc head padded out to a full lane tile
TILE_N      = 128      # instance rows per grid step


def iclassifier_kernel(x_ref, w_ref, b_ref, feats_ref, c_ref):
    x = x_ref[...]                                        # (TILE_N, D_IN) bf16

    # static slices of the packed parameter slabs (no extra DMAs)
    w_feat = w_ref[0:D_IN, :]                             # (D_IN, FEAT_SIZE) bf16
    w_fc   = w_ref[D_IN:D_IN + FEAT_SIZE, :]              # (FEAT_SIZE, LANE_PAD) bf16
    b_feat = b_ref[0:1, :]                                # (1, FEAT_SIZE) f32
    b_fc   = b_ref[1:2, :]                                # (1, LANE_PAD) f32

    # feature_extractor: per-instance Linear + ReLU (bf16 MXU, f32 accumulate)
    feats = jnp.dot(x, w_feat, preferred_element_type=jnp.float32) + b_feat
    feats = jnp.maximum(feats, 0.0)                       # (TILE_N, FEAT_SIZE) f32
    feats_ref[...] = feats                                # lane-dense store

    # fc head (padded to 128 lanes -> lane-dense output store)
    c = jnp.dot(feats.astype(jnp.bfloat16), w_fc,
                preferred_element_type=jnp.float32) + b_fc
    c_ref[...] = c                                        # (TILE_N, LANE_PAD) f32


def pack_params(p):
    """Pack the 4 parameter tensors into one weight slab + one bias slab."""
    w_fc_pad = jnp.zeros((FEAT_SIZE, LANE_PAD), jnp.float32).at[:, :NUM_CLS].set(p['w_fc'])
    b_fc_pad = jnp.zeros((1, LANE_PAD), jnp.float32).at[:, :NUM_CLS].set(p['b_fc'])
    w_packed = jnp.concatenate([p['w_feat'], w_fc_pad], axis=0).astype(jnp.bfloat16)
    b_packed = jnp.concatenate([p['b_feat'], b_fc_pad], axis=0).astype(jnp.float32)
    return w_packed, b_packed                             # (D_IN+FEAT,128) bf16, (2,128) f32


def iclassifier_forward(x, params):
    """x: (N, D_IN) f32 -> (feats (N, FEAT_SIZE) f32, c (N, NUM_CLS) f32)."""
    n = x.shape[0]
    assert n % TILE_N == 0, "N must be a multiple of TILE_N for this demo"
    w_packed, b_packed = pack_params(params)
    x_bf16 = x.astype(jnp.bfloat16)

    grid_spec = pltpu.PrefetchScalarGridSpec(
        num_scalar_prefetch=0,
        grid=(n // TILE_N,),
        in_specs=[
            pl.BlockSpec((TILE_N, D_IN), lambda i: (i, 0)),                 # x tile
            pl.BlockSpec((D_IN + FEAT_SIZE, LANE_PAD), lambda i: (0, 0)),   # weights (resident)
            pl.BlockSpec((2, LANE_PAD), lambda i: (0, 0)),                  # biases  (resident)
        ],
        out_specs=[
            pl.BlockSpec((TILE_N, FEAT_SIZE), lambda i: (i, 0)),            # feats
            pl.BlockSpec((TILE_N, LANE_PAD), lambda i: (i, 0)),             # c (lane-padded)
        ],
    )

    feats, c_pad = pl.pallas_call(
        iclassifier_kernel,
        out_shape=(jax.ShapeDtypeStruct((n, FEAT_SIZE), jnp.float32),
                   jax.ShapeDtypeStruct((n, LANE_PAD), jnp.float32)),
        grid_spec=grid_spec,
        compiler_params=pltpu.CompilerParams(
            dimension_semantics=("parallel",)),
    )(x_bf16, w_packed, b_packed)

    return feats, c_pad[:, :NUM_CLS]


def init_params(key):
    """PyTorch-style uniform(+-1/sqrt(fan_in)) init, stored as (in, out)."""
    ks = jax.random.split(key, 2)

    def linear(k, din, dout):
        bound = 1.0 / float(din) ** 0.5
        kw, kb = jax.random.split(k)
        w = jax.random.uniform(kw, (din, dout), jnp.float32, -bound, bound)
        b = jax.random.uniform(kb, (1, dout), jnp.float32, -bound, bound)
        return w, b

    w_feat, b_feat = linear(ks[0], D_IN, FEAT_SIZE)   # feature_extractor (Linear+ReLU)
    w_fc, b_fc = linear(ks[1], FEAT_SIZE, NUM_CLS)    # self.fc
    return dict(w_feat=w_feat, b_feat=b_feat, w_fc=w_fc, b_fc=b_fc)


def reference_forward(x, p):
    """Pure-JAX f32 reference mirroring IClassifier.forward."""
    feats = jax.nn.relu(x @ p['w_feat'] + p['b_feat'])
    c = feats @ p['w_fc'] + p['b_fc']
    return feats, c


if __name__ == "__main__":
    key = jax.random.PRNGKey(0)
    k_par, k_x = jax.random.split(key)

    params = init_params(k_par)
    x = jax.random.normal(k_x, (N_INSTANCES, D_IN), jnp.float32)

    feats, c = iclassifier_forward(x, params)
    feats = jax.block_until_ready(feats)
    c = jax.block_until_ready(c)

    feats_ref, c_ref = reference_forward(x, params)
    assert feats.shape == (N_INSTANCES, FEAT_SIZE)
    assert c.shape == (N_INSTANCES, NUM_CLS)
    # bf16 matmul inputs -> loosened tolerance vs the f32 reference
    assert jnp.allclose(feats, feats_ref, rtol=2e-2, atol=2e-2)
    assert jnp.allclose(c, c_ref, rtol=2e-2, atol=2e-2)

    print("KERNEL_OK")
</pallas_src>

<mosaic_0001>
module attributes {stable_mosaic.version = 11 : i64} {
  func.func @iclassifier_kernel(%arg0: i32, %arg1: memref<128x256xbf16, #tpu.memory_space<vmem>>, %arg2: memref<384x128xbf16, #tpu.memory_space<vmem>>, %arg3: memref<2x128xf32, #tpu.memory_space<vmem>>, %arg4: memref<128x128xf32, #tpu.memory_space<vmem>>, %arg5: memref<128x128xf32, #tpu.memory_space<vmem>>) attributes {dimension_semantics = [#tpu.dimension_semantics<parallel>], iteration_bounds = array<i64: 2>, scalar_prefetch = 0 : i64, scratch_operands = 0 : i64, tpu.core_type = #tpu.core_type<tc>, window_params = [{transform_indices = @transform_0, window_bounds = array<i64: 128, 256>}, {pipeline_mode = #tpu.pipeline_mode<synchronous>, transform_indices = @transform_1, window_bounds = array<i64: 384, 128>}, {pipeline_mode = #tpu.pipeline_mode<synchronous>, transform_indices = @transform_2, window_bounds = array<i64: 2, 128>}, {transform_indices = @transform_3, window_bounds = array<i64: 128, 128>}, {transform_indices = @transform_4, window_bounds = array<i64: 128, 128>}]} {
    %c0 = arith.constant 0 : index
    %c0_0 = arith.constant 0 : index
    %0 = vector.load %arg1[%c0, %c0_0] : memref<128x256xbf16, #tpu.memory_space<vmem>>, vector<128x256xbf16>
    %c0_1 = arith.constant 0 : index
    %c0_2 = arith.constant 0 : index
    %1 = vector.load %arg2[%c0_1, %c0_2] : memref<384x128xbf16, #tpu.memory_space<vmem>>, vector<256x128xbf16>
    %c256 = arith.constant 256 : index
    %c0_3 = arith.constant 0 : index
    %2 = vector.load %arg2[%c256, %c0_3] : memref<384x128xbf16, #tpu.memory_space<vmem>>, vector<128x128xbf16>
    %c0_4 = arith.constant 0 : index
    %c0_5 = arith.constant 0 : index
    %3 = vector.load %arg3[%c0_4, %c0_5] : memref<2x128xf32, #tpu.memory_space<vmem>>, vector<1x128xf32>
    %c1 = arith.constant 1 : index
    %c0_6 = arith.constant 0 : index
    %4 = vector.load %arg3[%c1, %c0_6] : memref<2x128xf32, #tpu.memory_space<vmem>>, vector<1x128xf32>
    %cst = arith.constant dense<0.000000e+00> : vector<128x128xf32>
    %5 = tpu.matmul %0, %1, %cst {dimension_numbers = #tpu.dot_dimension_numbers<[1], [0], [0], [1], [0, 0, 1, 1], [], []>} : vector<128x256xbf16>, vector<256x128xbf16>, vector<128x128xf32> -> vector<128x128xf32>
    %6 = vector.broadcast %3 : vector<1x128xf32> to vector<128x128xf32>
    %7 = arith.addf %5, %6 : vector<128x128xf32>
    %cst_7 = arith.constant 0.000000e+00 : f32
    %8 = vector.broadcast %cst_7 : f32 to vector<128x128xf32>
    %9 = arith.maximumf %7, %8 : vector<128x128xf32>
    %c0_8 = arith.constant 0 : index
    %c0_9 = arith.constant 0 : index
    %10 = vector.load %arg4[%c0_8, %c0_9] : memref<128x128xf32, #tpu.memory_space<vmem>>, vector<128x128xf32>
    tpu.vector_store %arg4[%c0_8, %c0_9], %9 {strides = array<i32>} : memref<128x128xf32, #tpu.memory_space<vmem>>, vector<128x128xf32>,
    %11 = arith.truncf %9 : vector<128x128xf32> to vector<128x128xbf16>
    %cst_10 = arith.constant dense<0.000000e+00> : vector<128x128xf32>
    %12 = tpu.matmul %11, %2, %cst_10 {dimension_numbers = #tpu.dot_dimension_numbers<[1], [0], [0], [1], [0, 0, 1, 1], [], []>} : vector<128x128xbf16>, vector<128x128xbf16>, vector<128x128xf32> -> vector<128x128xf32>
    %13 = vector.broadcast %4 : vector<1x128xf32> to vector<128x128xf32>
    %14 = arith.addf %12, %13 : vector<128x128xf32>
    %c0_11 = arith.constant 0 : index
    %c0_12 = arith.constant 0 : index
    %15 = vector.load %arg5[%c0_11, %c0_12] : memref<128x128xf32, #tpu.memory_space<vmem>>, vector<128x128xf32>
    tpu.vector_store %arg5[%c0_11, %c0_12], %14 {strides = array<i32>} : memref<128x128xf32, #tpu.memory_space<vmem>>, vector<128x128xf32>,
    return
  }
  func.func @transform_0(%arg0: i32) -> (i32, i32) {
    %c0_i32 = arith.constant 0 : i32
    %c0_i32_0 = arith.constant 0 : i32
    return %arg0, %c0_i32 : i32, i32
  }
  func.func @transform_1(%arg0: i32) -> (i32, i32) {
    %c0_i32 = arith.constant 0 : i32
    %c0_i32_0 = arith.constant 0 : i32
    %c0_i32_1 = arith.constant 0 : i32
    return %c0_i32, %c0_i32_0 : i32, i32
  }
  func.func @transform_2(%arg0: i32) -> (i32, i32) {
    %c0_i32 = arith.constant 0 : i32
    %c0_i32_0 = arith.constant 0 : i32
    %c0_i32_1 = arith.constant 0 : i32
    return %c0_i32, %c0_i32_0 : i32, i32
  }
  func.func @transform_3(%arg0: i32) -> (i32, i32) {
    %c0_i32 = arith.constant 0 : i32
    %c0_i32_0 = arith.constant 0 : i32
    return %arg0, %c0_i32 : i32, i32
  }
  func.func @transform_4(%arg0: i32) -> (i32, i32) {
    %c0_i32 = arith.constant 0 : i32
    %c0_i32_0 = arith.constant 0 : i32
    return %arg0, %c0_i32 : i32, i32
  }
}

</mosaic_0001>

<bundles_post_ra>
// kernel: tpu_custom_call.1
= control target key start
LH: loop header
LB: loop body
LE: loop exit
PB: predicated region body
PF: predicated region fallthrough
CT: control target
= control target key end

     0   :  { %10 = vsyncpa [#allocation3], 0  ;;  %s1740_s0 = inlined_call_operand.hbm [shape: bf16[256,256], index: 0, kind: input, shape index: {}]   ;;  %s1741_s1 = inlined_call_operand.hbm [shape: bf16[384,128], index: 1, kind: input, shape index: {}]   ;;  %s1742_s2 = inlined_call_operand.hbm [shape: f32[2,128], index: 2, kind: input, shape index: {}]   ;;  %s1743_s3 = inlined_call_operand.hbm [shape: f32[256,128], index: 3, kind: output, shape index: {0}]   ;;  %s1744_s4 = inlined_call_operand.hbm [shape: f32[256,128], index: 4, kind: output, shape index: {1}]  }
   0x1   :  { %12 = vsyncpa [#allocation3 + $0x1], 0 }
   0x2   :  { %13 = vsyncpa [#allocation6], 0 }
   0x3   :  { %14 = vsyncpa [#allocation4], 0 }
   0x4   :  { %16 = vsyncpa [#allocation4 + $0x1], 0 }
   0x5   :  { %17 = vsyncpa [#allocation10], 0 }
   0x6   :  { %19 = vsyncpa [#allocation10 + $0x1], 0  ;;  %s1480_s15 = smov 0   ;;  %s1482_s16 = smov 0  }
   0x7   :  { %s1484_s17 = smov 0   ;;  %s1486_s18 = smov 0  }
   0x8 LB: > { %s1501_s19 = sadd.s32 4294967295, %s1445_s18   ;;  %s922_s20 = sadd.s32 4294967294, %s1445_s18   ;;  %s1445_s18 = sphi %s1486_s18, %s1754_s18   ;;  %s1441_s17 = sphi %s1484_s17, %s1753_s17   ;;  %s1437_s16 = sphi %s1482_s16, %s1752_s16   ;;  %s1433_s15 = sphi %s1480_s15, %s1751_s15  }
   0x9   : > { %p45_p0 = scmp.ne.s32.totalorder %s1437_s16, %s1433_s15  ;;  %p46_p1 = scmp.eq.s32.totalorder %s1501_s19, 0 }
   0xa   : > { %p111_p2 = scmp.eq.s32.totalorder %s1501_s19, 1  ;;  %p117_p3 = scmp.eq.s32.totalorder %s922_s20, 1 }
   0xb   : > { %p1510_p4 = por %p46_p1, %p45_p0  ;;  %p923_p5 = scmp.ge.s32.totalorder %s1445_s18, 1 }
   0xc   : > { %p1515_p6 = por %p117_p3, %p45_p0  ;;  %p150_p7 = scmp.lt.s32.totalorder %s1445_s18, 3 }
   0xd   : > { %s161_s25 = sshll.u32 %s1741_s1, 4  ;;  %s1447_s27 = smov [#allocation5]   ;;  %s162_s25 = int_to_ptr.hbm [resolvable:$true] %s161_s25 }
   0xe   : > { %p1523_p8 = pnand %p923_p5, %p150_p7  ;;  %s163_s28 = sshll.u32 %s1447_s27, 4  ;;  %s164_s28 = int_to_ptr.vmem [resolvable:$true] %s163_s28 }
   0xf   : > { %s176_s5 = sshll.u32 %s1742_s2, 4  ;;  %s1448_s6 = smov 64   ;;  %s177_s5 = int_to_ptr.hbm [resolvable:$true] %s176_s5 }
  0x10   : > { %p1187_p9 = pneg %p1523_p8  ;;  %s1449_s7 = smov 4  }
  0x11   : > { %s1450_s8 = smov [#allocation7]   ;;  %s1536_s10 = sadd.s32 1, %s1445_s18  }
  0x12   : > { %p1188_p10 = pnand %p1187_p9, %p46_p1  ;;  %s178_s9 = sshll.u32 %s1450_s8, 4  ;;  %s179_s9 = int_to_ptr.vmem [resolvable:$true] %s178_s9 }
  0x13   : > { %s32_s11 = sadd.s32 1, %s1441_s17  ;;  %s29_s12 = ssub.s32 %s1445_s18, %s1536_s10 }
  0x14   : > { %1190 = dma.hbm_to_vmem [thread:$0]  (!%p1188_p10), %s162_s25, 3072, %s164_s28, [#allocation6], %s1448_s6, %s1448_s6, %s1449_s7  }
  0x15   : > { %1193 = dma.hbm_to_vmem [thread:$0]  (!%p1188_p10), %s177_s5, 32, %s179_s9, [#allocation6]  }
  0x16   : > { %p39_p12 = scmp.ne.s32.totalorder %s1441_s17, %s1437_s16  ;;  %p30_p13 = scmp.eq.s32.totalorder %s29_s12, 0 }
  0x17   : > { %p40_p0 = scmp.eq.s32.totalorder %s1445_s18, 0  ;;  %p1207_p5 = scmp.lt.s32.totalorder %s1445_s18, 2 }
  0x18   : > { %p1546_p3 = por %p111_p2, %p39_p12  ;;  %s189_s20 = sand.u32 1, %s1441_s17  }
  0x19   : > { %s1552_s14 = scalar_select %p30_p13, %s1441_s17, %s32_s11  }
  0x1a   : > { %p41_p7 = por %p40_p0, %p39_p12  ;;  %s927_s23 = sshll.u32 %s189_s20, 7 }
  0x1b   : > { %s1106_s24 = sshll.u32 %s1445_s18, 7  ;;  %s193_s29 = scalar_lea.vmem [#allocation2], %s927_s23 }
  0x1c   : > { %s199_s28 = scalar_lea.hbm %s1740_s0, %s1106_s24  ;;  %s202_s30 = sshll.u32 %s193_s29, 4  ;;  %s203_s30 = int_to_ptr.vmem [resolvable:$true] %s202_s30 }
  0x1d   : > { %s200_s5 = sshll.u32 %s199_s28, 4  ;;  %p1559_p2 = pnand %p1207_p5, %p41_p7  ;;  %s201_s5 = int_to_ptr.hbm [resolvable:$true] %s200_s5 }
  0x1e   : > { %s190_s7 = scalar_lea.sflag [#allocation3], %s189_s20  ;;  %s1313_s8 = sshra.s32 %s201_s5, 4  ;;  %s1314_s8 = int_to_ptr.hbm [resolvable:$true] %s1313_s8 }
  0x1f   : > { %s1315_s9 = scalar_lea.hbm %s1314_s8, 128  ;;  %p1317_p10 = pneg %p1559_p2 }
  0x20   : > { %p1316_p9 = scmp.ne.s32.totalorder %s1314_s8, %s1315_s9  ;;  %s1320_s23 = scalar_lea.hbm %s1740_s0, 256 }
  0x21   : > { %p1321_p0 = scmp.lt.s32.totalorder %s1314_s8, %s1740_s0  ;;  %p1322_p5 = scmp.lt.s32.totalorder %s1320_s23, %s1315_s9 }
  0x22   : > { %p1318_p12 = pnand %p1317_p10, %p1316_p9 }
  0x23   : > { %p1323_p7 = por %p1322_p5, %p1321_p0 }
  0x24   : > { %p1319_p13 = pneg %p1318_p12 }
  0x26   : > { %p1324_p11 = pnand %p1323_p7, %p1319_p13 }
  0x28   : > { %1327 = shalt.err (!%p1324_p11)
}
  0x29   : > { %s1451_s20 = smov 128   ;;  %s1452_s27 = smov 8  }
  0x2a   : > { %1197 = dma.hbm_to_vmem [thread:$0]  (!%p1559_p2), %s201_s5, 2048, %s203_s30, %s190_s7, %s1451_s20, %s1451_s20, %s1452_s27  }
  0x2b   : > { %214 = sbr.rel (%p1523_p8) target bundleno = 450 (0x1c2), region = 32  ;;  %s1576_s28 = sand.u32 (!%p1523_p8), 1, %s1437_s16  }
  0x2c   : > { %s1579_s29 = sshll.u32 (!%p1523_p8), %s1576_s28, 7  ;;  %s217_s8 = scalar_lea.sflag (!%p1523_p8), [#allocation3], %s1576_s28 }
  0x2d   : > { %s1583_s9 = scalar_lea.vmem (!%p1523_p8), [#allocation2], %s1579_s29 }
  0x30   : > { %1416 = dma.done.wait (%p1510_p4), %s217_s8, 2048  }
  0x31   : > { %1418 = vsyncadd (%p1510_p4), %s217_s8, 4294965248 }
  0x32   : > { %1420 = dma.done.wait (%p46_p1), [#allocation6], 3104  }
  0x33   : > { %1422 = vsyncadd (%p46_p1), [#allocation6], 4294964192  ;;  %v1130_v0 = vld [vmem:[#allocation5 + $0x38] sm:$0xff]  ;;  %v1129_v2 = vld [vmem:[#allocation5 + $0x30] sm:$0xff]  ;;  %s1629_s21 = scalar_lea.vmem [#allocation8], %s1579_s29  ;;  %s1147_s26 = sshll.u32 %s1501_s19, 7 }
  0x34   : > { %v1138_v1 = vld [vmem:[#allocation5 + $0x78] sm:$0xff]  ;;  %507 = vmatpush.bf16.msra.mxu0 %v1130_v0  ;;  %1149 = vmatpush.bf16.msra.mxu3 %v1130_v0  ;;  %v1137_v3 = vld [vmem:[#allocation5 + $0x70] sm:$0xff]  ;;  %v1128_v4 = vld [vmem:[#allocation5 + $0x28] sm:$0xff]  ;;  %s776_s6 = scalar_lea.hbm %s1743_s3, %s1147_s26  ;;  %s777_s7 = sshll.u32 %s1629_s21, 4  ;;  %s778_s7 = int_to_ptr.vmem [resolvable:$true] %s777_s7 }
  0x35   : > { %556 = vmatpush.bf16.msra.mxu1 %v1138_v1  ;;  %v1136_v5 = vld [vmem:[#allocation5 + $0x68] sm:$0xff]  ;;  %v1127_v6 = vld [vmem:[#allocation5 + $0x20] sm:$0xff]  ;;  %v1126_v8 = vld [vmem:[#allocation5 + $0x18] sm:$0xff]  ;;  %s779_s11 = sshll.u32 %s776_s6, 4  ;;  %s760_s12 = scalar_lea.sflag [#allocation4], %s1576_s28  ;;  %s780_s11 = int_to_ptr.hbm [resolvable:$true] %s779_s11 }
  0x36   : > { %v1135_v7 = vld [vmem:[#allocation5 + $0x60] sm:$0xff]  ;;  %v1134_v9 = vld [vmem:[#allocation5 + $0x58] sm:$0xff]  ;;  %v1125_v10 = vld [vmem:[#allocation5 + $0x10] sm:$0xff]  ;;  %s1357_s23 = sshra.s32 %s780_s11, 4  ;;  %s1363_s27 = scalar_lea.hbm %s1743_s3, 256  ;;  %s1358_s23 = int_to_ptr.hbm [resolvable:$true] %s1357_s23 }
  0x37   : > { %v1133_v11 = vld [vmem:[#allocation5 + $0x50] sm:$0xff]  ;;  %v1124_v12 = vld [vmem:[#allocation5 + $0x8] sm:$0xff]  ;;  %v1123_v14 = vld [vmem:[#allocation5] sm:$0xff]  ;;  %s1359_s24 = scalar_lea.hbm %s1358_s23, 128  ;;  %p1364_p11 = scmp.lt.s32.totalorder %s1358_s23, %s1743_s3 }
  0x38   : > { %508 = vmatpush.bf16.msra.mxu0 %v1129_v2  ;;  %1150 = vmatpush.bf16.msra.mxu3 %v1129_v2  ;;  %v1132_v13 = vld [vmem:[#allocation5 + $0x48] sm:$0xff]  ;;  %v939_v15 = vld [vmem:[%s1583_s9] sm:$0xf]  ;;  %v1107_v20 = vld [vmem:[%s1583_s9 + $0x4] sm:$0xf]  ;;  %p1360_p1 = scmp.ne.s32.totalorder %s1358_s23, %s1359_s24  ;;  %p1365_p2 = scmp.lt.s32.totalorder %s1363_s27, %s1359_s24 }
  0x39   : > { %557 = vmatpush.bf16.msra.mxu1 %v1137_v3  ;;  %v1108_v16 = vld [vmem:[%s1583_s9 + $0x4] sm:$0xf0]  ;;  %v987_v17 = vld [vmem:[%s1583_s9 + $0x60] sm:$0xf]  ;;  %v941_v21 = vld [vmem:[%s1583_s9 + $0x8] sm:$0xf0] }
  0x3a   : > { %v1120_v18 = vld [vmem:[%s1583_s9 + $0x64] sm:$0xf0]  ;;  %v1131_v19 = vld [vmem:[#allocation5 + $0x40] sm:$0xff]  ;;  %v940_v22 = vor.u32 %v1108_v16, %v939_v15  ;;  %v944_v24 = vor.u32 %v1107_v20, %v941_v21  ;;  %v947_v25 = vld [vmem:[%s1583_s9 + $0x10] sm:$0xf]  ;;  %p1361_p4 = pnand %p1360_p1, %p1546_p3  ;;  %p1366_p9 = por %p1365_p2, %p1364_p11 }
  0x3b   : > { %v988_v23 = vor.u32 %v1120_v18, %v987_v17  ;;  %v1110_v26 = vld [vmem:[%s1583_s9 + $0x14] sm:$0xf0]  ;;  %v995_v27 = vld [vmem:[%s1583_s9 + $0x70] sm:$0xf]  ;;  %v1109_v29 = vld [vmem:[%s1583_s9 + $0x14] sm:$0xf] }
  0x3c   : > { %509 = vmatpush.bf16.msra.mxu0 %v1128_v4  ;;  %1151 = vmatpush.bf16.msra.mxu3 %v1128_v4  ;;  %v1122_v28 = vld [vmem:[%s1583_s9 + $0x74] sm:$0xf0]  ;;  %v949_v30 = vld [vmem:[%s1583_s9 + $0x18] sm:$0xf0]  ;;  %v948_v31 = vor.u32 %v1110_v26, %v947_v25  ;;  %v955_v34 = vld [vmem:[%s1583_s9 + $0x20] sm:$0xf]  ;;  %p1362_p8 = pneg %p1361_p4 }
  0x3d   : > { %558 = vmatpush.bf16.msra.mxu1 %v1136_v5  ;;  %v996_v32 = vor.u32 %v1122_v28, %v995_v27  ;;  %v952_v33 = vor.u32 %v1109_v29, %v949_v30  ;;  %v1112_v35 = vld [vmem:[%s1583_s9 + $0x24] sm:$0xf0]  ;;  %v1119_v36 = vld [vmem:[%s1583_s9 + $0x64] sm:$0xf]  ;;  %v989_v37 = vld [vmem:[%s1583_s9 + $0x68] sm:$0xf0] }
  0x3e   : > { %v1111_v38 = vld [vmem:[%s1583_s9 + $0x24] sm:$0xf]  ;;  %v957_v39 = vld [vmem:[%s1583_s9 + $0x28] sm:$0xf0]  ;;  %v956_v40 = vor.u32 %v1112_v35, %v955_v34  ;;  %v992_v41 = vor.u32 %v1119_v36, %v989_v37  ;;  %v963_v43 = vld [vmem:[%s1583_s9 + $0x30] sm:$0xf]  ;;  %p1367_p10 = pnand %p1366_p9, %p1362_p8 }
  0x3f   : > { %v960_v42 = vor.u32 %v1111_v38, %v957_v39  ;;  %v1114_v44 = vld [vmem:[%s1583_s9 + $0x34] sm:$0xf0]  ;;  %v1121_v45 = vld [vmem:[%s1583_s9 + $0x74] sm:$0xf]  ;;  %v997_v46 = vld [vmem:[%s1583_s9 + $0x78] sm:$0xf0] }
  0x40   : > { %510 = vmatpush.bf16.msra.mxu0 %v1127_v6  ;;  %1152 = vmatpush.bf16.msra.mxu3 %v1127_v6  ;;  %v1113_v47 = vld [vmem:[%s1583_s9 + $0x34] sm:$0xf]  ;;  %v965_v48 = vld [vmem:[%s1583_s9 + $0x38] sm:$0xf0]  ;;  %v964_v49 = vor.u32 %v1114_v44, %v963_v43  ;;  %v1000_v50 = vor.u32 %v1121_v45, %v997_v46  ;;  %v1144_v54 = vld [vmem:[#allocation5 + $0xa8] sm:$0xff] }
  0x41   : > { %559 = vmatpush.bf16.msra.mxu1 %v1135_v7  ;;  %v968_v51 = vor.u32 %v1113_v47, %v965_v48  ;;  %v1146_v52 = vld [vmem:[#allocation5 + $0xb8] sm:$0xff]  ;;  %v1145_v53 = vld [vmem:[#allocation5 + $0xb0] sm:$0xff]  ;;  %v971_v55 = vld [vmem:[%s1583_s9 + $0x40] sm:$0xf] }
  0x42   : > { %694 = vmatpush.bf16.msra.mxu2 %v1146_v52  ;;  %v1116_v56 = vld [vmem:[%s1583_s9 + $0x44] sm:$0xf0]  ;;  %v1115_v57 = vld [vmem:[%s1583_s9 + $0x44] sm:$0xf]  ;;  %v973_v58 = vld [vmem:[%s1583_s9 + $0x48] sm:$0xf0] }
  0x43   : > { %v1143_v59 = vld [vmem:[#allocation5 + $0xa0] sm:$0xff]  ;;  %v972_v60 = vor.u32 %v1116_v56, %v971_v55  ;;  %v976_v61 = vor.u32 %v1115_v57, %v973_v58  ;;  %v979_v62 = vld [vmem:[%s1583_s9 + $0x50] sm:$0xf]  ;;  %v1118_v63 = vld [vmem:[%s1583_s9 + $0x54] sm:$0xf0] }
  0x44   : > { %511 = vmatpush.bf16.msra.mxu0 %v1126_v8  ;;  %1153 = vmatpush.bf16.msra.mxu3 %v1126_v8  ;;  %v1117_v0 = vld [vmem:[%s1583_s9 + $0x54] sm:$0xf]  ;;  %v980_v2 = vor.u32 %v1118_v63, %v979_v62  ;;  %v1142_v4 = vld [vmem:[#allocation5 + $0x98] sm:$0xff]  ;;  %v1140_v6 = vld [vmem:[#allocation5 + $0x88] sm:$0xff] }
  0x45   : > { %560 = vmatpush.bf16.msra.mxu1 %v1134_v9  ;;  %v1625_v8 = vld [vmem:[#allocation7] ss:$0 sm:$0xff] }
  0x46   : > { %695 = vmatpush.bf16.msra.mxu2 %v1145_v53 }
  0x48   : > { %512 = vmatpush.bf16.msra.mxu0 %v1125_v10  ;;  %1154 = vmatpush.bf16.msra.mxu3 %v1125_v10 }
  0x49   : > { %561 = vmatpush.bf16.msra.mxu1 %v1133_v11 }
  0x4a   : > { %696 = vmatpush.bf16.msra.mxu2 %v1144_v54 }
  0x4c   : > { %513 = vmatpush.bf16.msra.mxu0 %v1124_v12  ;;  %1155 = vmatpush.bf16.msra.mxu3 %v1124_v12 }
  0x4d   : > { %562 = vmatpush.bf16.msra.mxu1 %v1132_v13 }
  0x4e   : > { %697 = vmatpush.bf16.msra.mxu2 %v1143_v59 }
  0x50   : > { %514 = vmatpush.bf16.msra.mxu0 %v1123_v14  ;;  %1156 = vmatpush.bf16.msra.mxu3 %v1123_v14 }
  0x51   : > { %563 = vmatpush.bf16.msra.mxu1 %v1131_v19 }
  0x52   : > { %698 = vmatpush.bf16.msra.mxu2 %v1142_v4 }
  0x53   : > { %515 = vmatmul.bf16.vlgmr.msra.gmra.mxu0 %v940_v22  ;;  %545 = vmatmul.bf16.vlgmr.msra.gmra.mxu3 %v988_v23 }
  0x54   : > { %1157 = vmatpush.bf16.msrb.mxu3 %v1138_v1  ;;  %564 = vmatmul.bf16.vlgmr.msra.gmra.mxu1 %v944_v24  ;;  %v981_v1 = vld [vmem:[%s1583_s9 + $0x58] sm:$0xf0] }
  0x58   : > { %1158 = vmatpush.bf16.msrb.mxu3 %v1137_v3  ;;  %v984_v3 = vor.u32 %v1117_v0, %v981_v1 }
  0x5c   : > { %1159 = vmatpush.bf16.msrb.mxu3 %v1136_v5  ;;  %v1141_v5 = vld [vmem:[#allocation5 + $0x90] sm:$0xff] }
  0x5d   : > { %699 = vmatpush.bf16.msra.mxu2 %v1141_v5 }
  0x60   : > { %1160 = vmatpush.bf16.msrb.mxu3 %v1135_v7  ;;  %v1139_v7 = vld [vmem:[#allocation5 + $0x80] sm:$0xff] }
  0x61   : > { %700 = vmatpush.bf16.msra.mxu2 %v1140_v6 }
  0x63   : > { %520 = vmatmul.bf16.gmra.mxu0 %v948_v31  ;;  %550 = vmatmul.bf16.gmra.mxu3 %v996_v32 }
  0x64   : > { %1161 = vmatpush.bf16.msrb.mxu3 %v1134_v9  ;;  %569 = vmatmul.bf16.gmra.mxu1 %v952_v33 }
  0x65   : > { %701 = vmatpush.bf16.msra.mxu2 %v1139_v7 }
  0x68   : > { %1162 = vmatpush.bf16.msrb.mxu3 %v1133_v11 }
  0x6c   : > { %1163 = vmatpush.bf16.msrb.mxu3 %v1132_v13 }
  0x70   : > { %1164 = vmatpush.bf16.msrb.mxu3 %v1131_v19 }
  0x73   : > { %525 = vmatmul.bf16.gmra.mxu0 %v956_v40  ;;  %594 = vmatmul.bf16.vlgmr.msrb.gmra.mxu3 %v992_v41 }
  0x74   : > { %574 = vmatmul.bf16.gmra.mxu1 %v960_v42  ;;  %1165 = vmatpush.bf16.msra.mxu3 %v1146_v52 }
  0x78   : > { %1166 = vmatpush.bf16.msra.mxu3 %v1145_v53 }
  0x7c   : > { %1167 = vmatpush.bf16.msra.mxu3 %v1144_v54 }
  0x80   : > { %1168 = vmatpush.bf16.msra.mxu3 %v1143_v59 }
  0x83   : > { %530 = vmatmul.bf16.gmra.mxu0 %v964_v49  ;;  %599 = vmatmul.bf16.gmra.mxu3 %v1000_v50 }
  0x84   : > { %579 = vmatmul.bf16.gmra.mxu1 %v968_v51  ;;  %1169 = vmatpush.bf16.msra.mxu3 %v1142_v4 }
  0x88   : > { %1170 = vmatpush.bf16.msra.mxu3 %v1141_v5 }
  0x8c   : > { %1171 = vmatpush.bf16.msra.mxu3 %v1140_v6 }
  0x90   : > { %1172 = vmatpush.bf16.msra.mxu3 %v1139_v7 }
  0x93   : > { %535 = vmatmul.bf16.gmra.mxu0 %v972_v60 }
  0x94   : > { %584 = vmatmul.bf16.gmra.mxu1 %v976_v61 }
  0xa3   : > { %540 = vmatmul.bf16.gmra.mxu0 %v980_v2 }
  0xa4   : > { %589 = vmatmul.bf16.gmra.mxu1 %v984_v3 }
  0xd0   : > { %v516_v9 = vpop.f32.mrf.mxu0 }
  0xd1   : > { %v517_v10 = vadd.f32 %v1625_v8, %v516_v9  ;;  %v565_v11 = vpop.f32.mrf.mxu1 }
  0xd3   : > { %v566_v12 = vadd.f32 %v565_v11, %v517_v10 }
  0xd5   : > { %v605_v13 = vmax.f32 %v566_v12, 0.0 }
  0xd6   : > { %v546_v14 = vpop.f32.mrf.mxu3 }
  0xd7   : > { %621 = vst [vmem:[%s1629_s21] sm:$0xff] %v605_v13  ;;  %v547_v39 = vadd.f32 %v1625_v8, %v546_v14 }
  0xd8   : > { %v518_v15 = vpop.f32.mrf.mxu0 }
  0xd9   : > { %v519_v16 = vadd.f32 %v1625_v8, %v518_v15  ;;  %v567_v17 = vpop.f32.mrf.mxu1 }
  0xdb   : > { %v568_v18 = vadd.f32 %v567_v17, %v519_v16 }
  0xdd   : > { %v606_v19 = vmax.f32 %v568_v18, 0.0 }
  0xde   : > { %v548_v20 = vpop.f32.mrf.mxu3 }
  0xdf   : > { %622 = vst [vmem:[%s1629_s21 + $0x8] sm:$0xff] %v606_v19  ;;  %v637_v21 = vpack.c.bf16 %v606_v19, %v605_v13  ;;  %v549_v48 = vadd.f32 %v1625_v8, %v548_v20 }
  0xe0   : > { %v521_v22 = vpop.f32.mrf.mxu0 }
  0xe1   : > { %v522_v23 = vadd.f32 %v1625_v8, %v521_v22  ;;  %v570_v24 = vpop.f32.mrf.mxu1  ;;  %702 = vmatmul.bf16.vlgmr.msra.gmra.mxu2 %v637_v21 }
  0xe3   : > { %v571_v25 = vadd.f32 %v570_v24, %v522_v23 }
  0xe5   : > { %v607_v26 = vmax.f32 %v571_v25, 0.0 }
  0xe6   : > { %v551_v27 = vpop.f32.mrf.mxu3 }
  0xe7   : > { %623 = vst [vmem:[%s1629_s21 + $0x10] sm:$0xff] %v607_v26  ;;  %v552_v59 = vadd.f32 %v1625_v8, %v551_v27 }
  0xe8   : > { %v523_v28 = vpop.f32.mrf.mxu0 }
  0xe9   : > { %v524_v29 = vadd.f32 %v1625_v8, %v523_v28  ;;  %v572_v30 = vpop.f32.mrf.mxu1 }
  0xeb   : > { %v573_v31 = vadd.f32 %v572_v30, %v524_v29 }
  0xed   : > { %v608_v32 = vmax.f32 %v573_v31, 0.0 }
  0xee   : > { %v553_v33 = vpop.f32.mrf.mxu3 }
  0xef   : > { %624 = vst [vmem:[%s1629_s21 + $0x18] sm:$0xff] %v608_v32  ;;  %v638_v34 = vpack.c.bf16 %v608_v32, %v607_v26  ;;  %v554_v4 = vadd.f32 %v1625_v8, %v553_v33 }
  0xf0   : > { %v526_v35 = vpop.f32.mrf.mxu0 }
  0xf1   : > { %v527_v36 = vadd.f32 %v1625_v8, %v526_v35  ;;  %v575_v37 = vpop.f32.mrf.mxu1  ;;  %707 = vmatmul.bf16.gmra.mxu2 %v638_v34 }
  0xf3   : > { %v576_v38 = vadd.f32 %v575_v37, %v527_v36 }
  0xf5   : > { %v609_v40 = vmax.f32 %v576_v38, 0.0 }
  0xf6   : > { %v595_v41 = vpop.f32.mrf.mxu3 }
  0xf7   : > { %625 = vst [vmem:[%s1629_s21 + $0x20] sm:$0xff] %v609_v40  ;;  %v596_v42 = vadd.f32 %v595_v41, %v547_v39 }
  0xf8   : > { %v528_v43 = vpop.f32.mrf.mxu0 }
  0xf9   : > { %v617_v44 = vmax.f32 %v596_v42, 0.0  ;;  %v529_v45 = vadd.f32 %v1625_v8, %v528_v43  ;;  %v577_v46 = vpop.f32.mrf.mxu1 }
  0xfb   : > { %633 = vst [vmem:[%s1629_s21 + $0x60] sm:$0xff] %v617_v44  ;;  %v578_v47 = vadd.f32 %v577_v46, %v529_v45 }
  0xfd   : > { %v610_v49 = vmax.f32 %v578_v47, 0.0 }
  0xfe   : > { %v597_v50 = vpop.f32.mrf.mxu3 }
  0xff   : > { %626 = vst [vmem:[%s1629_s21 + $0x28] sm:$0xff] %v610_v49  ;;  %v598_v51 = vadd.f32 %v597_v50, %v549_v48  ;;  %v639_v52 = vpack.c.bf16 %v610_v49, %v609_v40 }
 0x100   : > { %v531_v53 = vpop.f32.mrf.mxu0 }
 0x101   : > { %v618_v54 = vmax.f32 %v598_v51, 0.0  ;;  %v532_v55 = vadd.f32 %v1625_v8, %v531_v53  ;;  %v580_v56 = vpop.f32.mrf.mxu1  ;;  %712 = vmatmul.bf16.gmra.mxu2 %v639_v52 }
 0x103   : > { %634 = vst [vmem:[%s1629_s21 + $0x68] sm:$0xff] %v618_v54  ;;  %v643_v57 = vpack.c.bf16 %v618_v54, %v617_v44  ;;  %v581_v58 = vadd.f32 %v580_v56, %v532_v55 }
 0x105   : > { %v611_v60 = vmax.f32 %v581_v58, 0.0  ;;  %732 = vmatmul.bf16.vlgmr.msra.gmra.mxu3 %v643_v57 }
 0x106   : > { %v600_v61 = vpop.f32.mrf.mxu3 }
 0x107   : > { %627 = vst [vmem:[%s1629_s21 + $0x30] sm:$0xff] %v611_v60  ;;  %v601_v62 = vadd.f32 %v600_v61, %v552_v59 }
 0x108   : > { %v533_v63 = vpop.f32.mrf.mxu0 }
 0x109   : > { %v619_v0 = vmax.f32 %v601_v62, 0.0  ;;  %v534_v1 = vadd.f32 %v1625_v8, %v533_v63  ;;  %v582_v2 = vpop.f32.mrf.mxu1 }
 0x10b   : > { %635 = vst [vmem:[%s1629_s21 + $0x70] sm:$0xff] %v619_v0  ;;  %v583_v3 = vadd.f32 %v582_v2, %v534_v1 }
 0x10d   : > { %v612_v5 = vmax.f32 %v583_v3, 0.0 }
 0x10e   : > { %v602_v6 = vpop.f32.mrf.mxu3 }
 0x10f   : > { %628 = vst [vmem:[%s1629_s21 + $0x38] sm:$0xff] %v612_v5  ;;  %v603_v7 = vadd.f32 %v602_v6, %v554_v4  ;;  %v640_v9 = vpack.c.bf16 %v612_v5, %v611_v60 }
 0x110   : > { %v536_v10 = vpop.f32.mrf.mxu0 }
 0x111   : > { %v620_v11 = vmax.f32 %v603_v7, 0.0  ;;  %v537_v12 = vadd.f32 %v1625_v8, %v536_v10  ;;  %v585_v13 = vpop.f32.mrf.mxu1  ;;  %717 = vmatmul.bf16.gmra.mxu2 %v640_v9 }
 0x113   : > { %636 = vst [vmem:[%s1629_s21 + $0x78] sm:$0xff] %v620_v11  ;;  %v586_v14 = vadd.f32 %v585_v13, %v537_v12  ;;  %v644_v15 = vpack.c.bf16 %v620_v11, %v619_v0 }
 0x115   : > { %v613_v16 = vmax.f32 %v586_v14, 0.0  ;;  %737 = vmatmul.bf16.gmra.mxu3 %v644_v15 }
 0x117   : > { %629 = vst [vmem:[%s1629_s21 + $0x40] sm:$0xff] %v613_v16 }
 0x118   : > { %v538_v17 = vpop.f32.mrf.mxu0 }
 0x119   : > { %v539_v18 = vadd.f32 %v1625_v8, %v538_v17  ;;  %v587_v19 = vpop.f32.mrf.mxu1 }
 0x11b   : > { %v588_v20 = vadd.f32 %v587_v19, %v539_v18 }
 0x11d   : > { %v614_v21 = vmax.f32 %v588_v20, 0.0 }
 0x11f   : > { %630 = vst [vmem:[%s1629_s21 + $0x48] sm:$0xff] %v614_v21  ;;  %v641_v22 = vpack.c.bf16 %v614_v21, %v613_v16 }
 0x120   : > { %v541_v23 = vpop.f32.mrf.mxu0 }
 0x121   : > { %v542_v24 = vadd.f32 %v1625_v8, %v541_v23  ;;  %v590_v25 = vpop.f32.mrf.mxu1  ;;  %722 = vmatmul.bf16.gmra.mxu2 %v641_v22 }
 0x123   : > { %v591_v26 = vadd.f32 %v590_v25, %v542_v24 }
 0x125   : > { %v615_v27 = vmax.f32 %v591_v26, 0.0 }
 0x127   : > { %631 = vst [vmem:[%s1629_s21 + $0x50] sm:$0xff] %v615_v27 }
 0x128   : > { %v543_v28 = vpop.f32.mrf.mxu0 }
 0x129   : > { %v544_v29 = vadd.f32 %v1625_v8, %v543_v28  ;;  %v592_v30 = vpop.f32.mrf.mxu1 }
 0x12b   : > { %v593_v31 = vadd.f32 %v592_v30, %v544_v29 }
 0x12d   : > { %v616_v32 = vmax.f32 %v593_v31, 0.0 }
 0x12f   : > { %632 = vst [vmem:[%s1629_s21 + $0x58] sm:$0xff] %v616_v32  ;;  %v642_v33 = vpack.c.bf16 %v616_v32, %v615_v27 }
 0x131   : > { %727 = vmatmul.bf16.gmra.mxu2 %v642_v33 }
 0x132   : > { %1370 = shalt.err (!%p1367_p10)
}
 0x133   : > { %s1453_s21 = smov 128   ;;  %s1454_s30 = smov 8   ;;  %v1252_v8 = vld [vmem:[#allocation7 + $0x1] ss:$0 sm:$0xff] }
 0x134   : > { %1183 = dma.vmem_to_hbm [thread:$0]  (%p1546_p3), %s778_s7, 2048, %s780_s11, %s760_s12, %s1453_s21, %s1453_s21, %s1454_s30  }
 0x135   : > { %s1684_s5 = scalar_lea.vmem [#allocation9], %s1579_s29  ;;  %s793_s7 = scalar_lea.hbm %s1744_s4, %s1147_s26 }
 0x136   : > { %s794_s11 = sshll.u32 %s1684_s5, 4  ;;  %s796_s12 = sshll.u32 %s793_s7, 4  ;;  %s795_s11 = int_to_ptr.vmem [resolvable:$true] %s794_s11  ;;  %s797_s12 = int_to_ptr.hbm [resolvable:$true] %s796_s12 }
 0x137   : > { %s765_s23 = scalar_lea.sflag [#allocation10], %s1576_s28  ;;  %s1385_s24 = sshra.s32 %s797_s12, 4  ;;  %s1386_s24 = int_to_ptr.hbm [resolvable:$true] %s1385_s24 }
 0x138   : > { %s1387_s25 = scalar_lea.hbm %s1386_s24, 128  ;;  %s1391_s27 = scalar_lea.hbm %s1744_s4, 256 }
 0x139   : > { %p1388_p12 = scmp.ne.s32.totalorder %s1386_s24, %s1387_s25  ;;  %p1392_p5 = scmp.lt.s32.totalorder %s1386_s24, %s1744_s4 }
 0x13a   : > { %p1393_p7 = scmp.lt.s32.totalorder %s1391_s27, %s1387_s25 }
 0x13b   : > { %p1389_p13 = pnand %p1388_p12, %p1546_p3 }
 0x13c   : > { %p1394_p1 = por %p1393_p7, %p1392_p5 }
 0x13d   : > { %p1390_p0 = pneg %p1389_p13 }
 0x13f   : > { %p1395_p4 = pnand %p1394_p1, %p1390_p0 }
 0x164   : > { %v703_v34 = vpop.f32.mrf.mxu2 }
 0x165   : > { %v704_v35 = vadd.f32 %v1252_v8, %v703_v34 }
 0x167   : > { %743 = vst [vmem:[%s1684_s5] sm:$0xff] %v704_v35 }
 0x16c   : > { %v705_v36 = vpop.f32.mrf.mxu2 }
 0x16d   : > { %v706_v37 = vadd.f32 %v1252_v8, %v705_v36 }
 0x16f   : > { %744 = vst [vmem:[%s1684_s5 + $0x8] sm:$0xff] %v706_v37 }
 0x174   : > { %v708_v38 = vpop.f32.mrf.mxu2 }
 0x175   : > { %v709_v39 = vadd.f32 %v1252_v8, %v708_v38 }
 0x177   : > { %745 = vst [vmem:[%s1684_s5 + $0x10] sm:$0xff] %v709_v39 }
 0x17c   : > { %v710_v40 = vpop.f32.mrf.mxu2 }
 0x17d   : > { %v711_v41 = vadd.f32 %v1252_v8, %v710_v40 }
 0x17f   : > { %746 = vst [vmem:[%s1684_s5 + $0x18] sm:$0xff] %v711_v41 }
 0x184   : > { %v713_v42 = vpop.f32.mrf.mxu2 }
 0x185   : > { %v714_v43 = vadd.f32 %v1252_v8, %v713_v42 }
 0x187   : > { %747 = vst [vmem:[%s1684_s5 + $0x20] sm:$0xff] %v714_v43 }
 0x188   : > { %v733_v44 = vpop.f32.mrf.mxu3 }
 0x189   : > { %v734_v45 = vadd.f32 %v1252_v8, %v733_v44 }
 0x18b   : > { %755 = vst [vmem:[%s1684_s5 + $0x60] sm:$0xff] %v734_v45 }
 0x18c   : > { %v715_v46 = vpop.f32.mrf.mxu2 }
 0x18d   : > { %v716_v47 = vadd.f32 %v1252_v8, %v715_v46 }
 0x18f   : > { %748 = vst [vmem:[%s1684_s5 + $0x28] sm:$0xff] %v716_v47 }
 0x190   : > { %v735_v48 = vpop.f32.mrf.mxu3 }
 0x191   : > { %v736_v49 = vadd.f32 %v1252_v8, %v735_v48 }
 0x193   : > { %756 = vst [vmem:[%s1684_s5 + $0x68] sm:$0xff] %v736_v49 }
 0x194   : > { %v718_v50 = vpop.f32.mrf.mxu2 }
 0x195   : > { %v719_v51 = vadd.f32 %v1252_v8, %v718_v50 }
 0x197   : > { %749 = vst [vmem:[%s1684_s5 + $0x30] sm:$0xff] %v719_v51 }
 0x198   : > { %v738_v52 = vpop.f32.mrf.mxu3 }
 0x199   : > { %v739_v53 = vadd.f32 %v1252_v8, %v738_v52 }
 0x19b   : > { %757 = vst [vmem:[%s1684_s5 + $0x70] sm:$0xff] %v739_v53 }
 0x19c   : > { %v720_v54 = vpop.f32.mrf.mxu2 }
 0x19d   : > { %v721_v55 = vadd.f32 %v1252_v8, %v720_v54 }
 0x19f   : > { %750 = vst [vmem:[%s1684_s5 + $0x38] sm:$0xff] %v721_v55 }
 0x1a0   : > { %v740_v56 = vpop.f32.mrf.mxu3 }
 0x1a1   : > { %v741_v57 = vadd.f32 %v1252_v8, %v740_v56 }
 0x1a3   : > { %758 = vst [vmem:[%s1684_s5 + $0x78] sm:$0xff] %v741_v57 }
 0x1a4   : > { %v723_v58 = vpop.f32.mrf.mxu2 }
 0x1a5   : > { %v724_v59 = vadd.f32 %v1252_v8, %v723_v58 }
 0x1a7   : > { %751 = vst [vmem:[%s1684_s5 + $0x40] sm:$0xff] %v724_v59 }
 0x1ac   : > { %v725_v60 = vpop.f32.mrf.mxu2 }
 0x1ad   : > { %v726_v61 = vadd.f32 %v1252_v8, %v725_v60 }
 0x1af   : > { %752 = vst [vmem:[%s1684_s5 + $0x48] sm:$0xff] %v726_v61 }
 0x1b4   : > { %v728_v62 = vpop.f32.mrf.mxu2 }
 0x1b5   : > { %v729_v63 = vadd.f32 %v1252_v8, %v728_v62 }
 0x1b7   : > { %753 = vst [vmem:[%s1684_s5 + $0x50] sm:$0xff] %v729_v63 }
 0x1bc   : > { %v730_v0 = vpop.f32.mrf.mxu2 }
 0x1bd   : > { %v731_v1 = vadd.f32 %v1252_v8, %v730_v0 }
 0x1bf   : > { %754 = vst [vmem:[%s1684_s5 + $0x58] sm:$0xff] %v731_v1 }
 0x1c0   : > { %1398 = shalt.err (!%p1395_p4)
}
 0x1c1   : > { %1184 = dma.vmem_to_hbm [thread:$0]  (%p1546_p3), %s795_s11, 2048, %s797_s12, %s765_s23, %s1453_s21, %s1453_s21, %s1454_s30  }
 0x1c2 PF: > { %s811_s28 = sand.u32 1, %s1433_s15   ;;  %p1750_p8 = scmp.ge.s32.totalorder %s1445_s18, 2 }
 0x1c3   : > { %s812_s9 = scalar_lea.sflag [#allocation4], %s811_s28 }
 0x1c4   : > { %p1199_p11 = pnand %p1750_p8, %p1515_p6 }
 0x1c6   : > { %p1200_p2 = pneg %p1199_p11 }
 0x1c8   : > { %1424 = dma.done.wait (%p1200_p2), %s812_s9, 2048  }
 0x1c9   : > { %1426 = vsyncadd (%p1200_p2), %s812_s9, 4294965248  ;;  %s822_s5 = scalar_lea.sflag [#allocation10], %s811_s28 }
 0x1ca   : > { %1428 = dma.done.wait (%p1200_p2), %s822_s5, 2048  }
 0x1cb   : > { %1430 = vsyncadd (%p1200_p2), %s822_s5, 4294965248  ;;  %p22_p3 = scmp.ge.s32.totalorder %s1536_s10, 4   ;;  %s1751_s15 = smov %s1437_s16 }
 0x1cc   : > { %s1752_s16 = smov %s1441_s17  ;;  %s1753_s17 = smov %s1552_s14 }
 0x1cd   : > { %s1754_s18 = smov %s1536_s10  ;;  %24 = sbr.rel (!%p22_p3) target bundleno = 8 (0x8), region = 102 }
 0x1d2   :  { %828 = vsyncpa [#allocation3], 1 }
 0x1d3   :  { %830 = vsyncpa [#allocation3 + $0x1], 1 }
 0x1d4   :  { %831 = vsyncpa [#allocation6], 1 }
 0x1d5   :  { %832 = vsyncpa [#allocation4], 1 }
 0x1d6   :  { %834 = vsyncpa [#allocation4 + $0x1], 1 }
 0x1d7   :  { %835 = vsyncpa [#allocation10], 1 }
 0x1d8   :  { %837 = vsyncpa [#allocation10 + $0x1], 1 }

</bundles_post_ra>
